<compile_context>
chip_gen: v7x
topology: tpu7x:2x2x1
jax: 0.10.0
libtpu: 0.0.40
codegen_flags: <defaults>
</compile_context>

<pallas_src>
import jax
import jax.numpy as jnp
from jax.experimental import pallas as pl
from jax.experimental.pallas import tpu as pltpu

_LANE = 128


def _round_up(c, m=_LANE):
    return ((c + m - 1) // m) * m


def _chip_policy():
    """Chip-aware tiling / VMEM policy (v7x: 64 MiB VMEM/TC + 2 TCs; v5e/v6e: 128 MiB, 1 TC)."""
    vmem = 64 * 1024 * 1024
    try:
        info = pltpu.get_tpu_info()
        vmem = int(getattr(info, "vmem_capacity_bytes", vmem))
    except Exception:      # no TPU info available -> conservative (v7x-safe) defaults
        pass
    if vmem <= 64 * 1024 * 1024:
        # v7x-class: keep >=4 steps so both TensorCores get pipelined work.
        return dict(vmem_limit=48 * 1024 * 1024, min_steps=4, tm_cap=1024)
    # Single-TC 128 MiB parts: 2 steps is enough for double buffering; big row tiles.
    return dict(vmem_limit=100 * 1024 * 1024, min_steps=2, tm_cap=2048)


def _pick_tm(m, min_steps, cap):
    cands = [t for t in (4096, 2048, 1024, 512, 256, 128, 64, 32, 16, 8) if t <= cap]
    for tm in cands:
        if m % tm == 0 and m // tm >= min_steps:
            return tm
    for tm in cands:
        if m % tm == 0:
            return tm
    return m


# ---------------------------------------------------------------------------
# Kernel 1: stem — a = cv_a(x), y = cv_b(x) in one matmul (weights concatenated on N)
# ---------------------------------------------------------------------------
def _stem_kernel(x_ref, w_ref, a_ref, y_ref):
    x = x_ref[...].astype(jnp.bfloat16)
    r = jnp.dot(x, w_ref[...], preferred_element_type=jnp.float32)
    cp = a_ref.shape[-1]
    a_ref[...] = r[:, :cp].astype(a_ref.dtype)
    y_ref[...] = r[:, cp:].astype(y_ref.dtype)


def stem_conv(x2d, w_ab, c_p, policy):
    M, K = x2d.shape
    TM = _pick_tm(M, policy["min_steps"], policy["tm_cap"])
    row = lambda n: pl.BlockSpec((TM, n), lambda i: (i, 0))
    full = lambda shp: pl.BlockSpec(shp, lambda i: (0, 0))
    return pl.pallas_call(
        _stem_kernel,
        out_shape=(jax.ShapeDtypeStruct((M, c_p), jnp.bfloat16),
                   jax.ShapeDtypeStruct((M, c_p), jnp.bfloat16)),
        grid=(M // TM,),
        in_specs=[row(K), full((K, 2 * c_p))],
        out_specs=[row(c_p), row(c_p)],
        compiler_params=pltpu.CompilerParams(
            dimension_semantics=("parallel",),
            vmem_limit_bytes=policy["vmem_limit"]),
    )(x2d, w_ab)


# ---------------------------------------------------------------------------
# Kernel 2: fused Bottleneck chain — grid=(image, layer); activation carried in
# an f32 VMEM scratch across the "arbitrary" layer axis; 3x3 as one K=9C matmul.
# ---------------------------------------------------------------------------
def _bottleneck_chain_kernel(y_ref, w1_ref, s1_ref, b1_ref, w9_ref, s2_ref, b2_ref,
                             o_ref, ycur_ref, tpad_ref, col_ref):
    _, H, W, C = y_ref.shape
    HW = H * W
    layer = pl.program_id(1)

    @pl.when(layer == 0)
    def _():                                     # load the carried activation once per image
        ycur_ref[...] = y_ref[0].astype(jnp.float32)

    y2d = ycur_ref[...].reshape(HW, C)           # f32 residual carry across layers

    # cv1: 1x1 conv + BN + SiLU (f32 epilogue)
    t = jnp.dot(y2d.astype(jnp.bfloat16), w1_ref[0],
                preferred_element_type=jnp.float32)
    t = t * s1_ref[0] + b1_ref[0]
    t = t * jax.nn.sigmoid(t)

    # Zero-haloed scratch: interior at sublane-aligned column 8 (unmasked stores);
    # only the 1-wide border slabs are zeroed (the interior is fully overwritten).
    bz = lambda shp: jnp.zeros(shp, tpad_ref.dtype)
    tpad_ref[0:1, 7:W + 9, :] = bz((1, W + 2, C))
    tpad_ref[H + 1:H + 2, 7:W + 9, :] = bz((1, W + 2, C))
    tpad_ref[1:H + 1, 7:8, :] = bz((H, 1, C))
    tpad_ref[1:H + 1, W + 8:W + 9, :] = bz((H, 1, C))
    tpad_ref[1:H + 1, 8:W + 8, :] = t.reshape(H, W, C).astype(tpad_ref.dtype)

    # In-VMEM im2col, then ONE matmul with K = 9*C: accumulation stays inside the
    # MXU (no per-tap result pops / f32 VPU adds).  Tap writes are lane-aligned.
    for dy in range(3):
        for dx in range(3):
            tap = 3 * dy + dx
            col_ref[:, :, tap * C:(tap + 1) * C] = \
                tpad_ref[dy:dy + H, 7 + dx:7 + dx + W, :]

    acc = jnp.dot(col_ref[...].reshape(HW, 9 * C), w9_ref[0],
                  preferred_element_type=jnp.float32)
    z = acc * s2_ref[0] + b2_ref[0]
    z = z * jax.nn.sigmoid(z)                    # SiLU

    ynew = y2d + z                               # Bottleneck shortcut, kept in f32
    ycur_ref[...] = ynew.reshape(H, W, C)

    @pl.when(layer == pl.num_programs(1) - 1)
    def _():                                     # write HBM only after the last layer
        o_ref[...] = ynew.reshape(1, H, W, C).astype(o_ref.dtype)


def bottleneck_chain(y_nhwc, w1, s1, b1, w9, s2, b2, policy):
    # TODO(synk): for very large H*W (e.g. 160x160x256) row-tile each image over H
    # with a manual halo DMA (memory_space=pl.ANY + pltpu.make_async_copy) so the
    # im2col scratch fits v7x's 64 MiB VMEM and both TensorCores get work at N=1.
    N, H, W, C = y_nhwc.shape
    n_layers = w1.shape[0]
    img = pl.BlockSpec((1, H, W, C), lambda b, l: (b, 0, 0, 0))
    per_layer = lambda shp: pl.BlockSpec((1,) + shp, lambda b, l: (l,) + (0,) * len(shp))
    return pl.pallas_call(
        _bottleneck_chain_kernel,
        out_shape=jax.ShapeDtypeStruct((N, H, W, C), jnp.bfloat16),
        grid=(N, n_layers),
        in_specs=[img,
                  per_layer((C, C)), per_layer((1, C)), per_layer((1, C)),
                  per_layer((9 * C, C)), per_layer((1, C)), per_layer((1, C))],
        out_specs=img,
        scratch_shapes=[pltpu.VMEM((H, W, C), jnp.float32),          # carried activation
                        pltpu.VMEM((H + 2, W + 16, C), jnp.bfloat16),  # haloed cv1 output
                        pltpu.VMEM((H, W, 9 * C), jnp.bfloat16)],      # im2col
        compiler_params=pltpu.CompilerParams(
            dimension_semantics=("parallel", "arbitrary"),
            vmem_limit_bytes=policy["vmem_limit"]),
    )(y_nhwc, w1, s1, b1, w9, s2, b2)


# ---------------------------------------------------------------------------
# Kernel 3: tail — yb = cv1(y); cv2( LeakyReLU(BN( cat(a, yb) )) ), concat eliminated
# ---------------------------------------------------------------------------
def _tail_kernel(a_ref, y_ref, wc1_ref, psa_ref, pba_ref, psy_ref, pby_ref,
                 wt_ref, wb_ref, s_ref, b_ref, o_ref):
    # a-half: BN + LeakyReLU(0.1)
    za = a_ref[...].astype(jnp.float32) * psa_ref[...] + pba_ref[...]
    za = jnp.where(za > 0, za, 0.1 * za)
    # yb-half: raw 1x1 conv (cv1), then BN + LeakyReLU(0.1)
    yb = jnp.dot(y_ref[...], wc1_ref[...], preferred_element_type=jnp.float32)
    zy = yb * psy_ref[...] + pby_ref[...]
    zy = jnp.where(zy > 0, zy, 0.1 * zy)
    # cv2 on the virtual concat: a @ W_top + yb @ W_bot   (cat axis == contraction axis)
    acc = jnp.dot(za.astype(jnp.bfloat16), wt_ref[...],
                  preferred_element_type=jnp.float32)
    acc = acc + jnp.dot(zy.astype(jnp.bfloat16), wb_ref[...],
                        preferred_element_type=jnp.float32)
    out = acc * s_ref[...] + b_ref[...]
    out = out * jax.nn.sigmoid(out)                        # SiLU
    o_ref[...] = out.astype(o_ref.dtype)


def csp_tail(a2d, y2d, wc1, psa, pba, psy, pby, wt, wb, s, b, c2p, policy):
    # TODO(synk): switch out_shape to bf16 when the downstream consumer accepts it
    # (halves the dominant HBM writeback); kept f32 here as this is the module output.
    M, c_p = a2d.shape
    TM = _pick_tm(M, policy["min_steps"], policy["tm_cap"])
    row = lambda n: pl.BlockSpec((TM, n), lambda i: (i, 0))
    full = lambda shp: pl.BlockSpec(shp, lambda i: (0, 0))
    return pl.pallas_call(
        _tail_kernel,
        out_shape=jax.ShapeDtypeStruct((M, c2p), jnp.float32),
        grid=(M // TM,),
        in_specs=[row(c_p), row(c_p), full((c_p, c_p)),
                  full((1, c_p)), full((1, c_p)), full((1, c_p)), full((1, c_p)),
                  full((c_p, c2p)), full((c_p, c2p)),
                  full((1, c2p)), full((1, c2p))],
        out_specs=row(c2p),
        compiler_params=pltpu.CompilerParams(
            dimension_semantics=("parallel",),
            vmem_limit_bytes=policy["vmem_limit"]),
    )(a2d, y2d, wc1, psa, pba, psy, pby, wt, wb, s, b)


# ---------------------------------------------------------------------------
# Parameter folding / padding (plain JAX glue, done once per set of weights)
# ---------------------------------------------------------------------------
def fold_bn(gamma, beta, mean, var, eps=1e-5):
    scale = gamma / jnp.sqrt(var + eps)
    bias = beta - mean * scale
    return scale, bias


def _pad_mat(w, rows, cols, dtype=jnp.bfloat16):
    r, c = w.shape
    return jnp.pad(w, ((0, rows - r), (0, cols - c))).astype(dtype)


def _pad_vec(v, n, fill):
    return jnp.pad(v, (0, n - v.shape[0]),
                   constant_values=fill).reshape(1, n).astype(jnp.float32)


def _w1x1(w):            # torch (Cout, Cin, 1, 1) -> (Cin, Cout)
    return jnp.transpose(w[:, :, 0, 0], (1, 0))


def _w3x3_taps(w):       # torch (Cout, Cin, 3, 3) -> (9, Cin, Cout), tap = 3*ky + kx
    cout, cin = w.shape[0], w.shape[1]
    return jnp.transpose(w, (2, 3, 1, 0)).reshape(9, cin, cout)


def prepare_weights(params):
    c1, c2, c_ = params['c1'], params['c2'], params['c_']
    c_p, c2p = _round_up(c_), _round_up(c2)
    policy = _chip_policy()

    # stem: cv_a | cv_b concatenated along output channels (a first, matching cat order)
    w_ab = jnp.concatenate(
        [_pad_mat(_w1x1(params['cv_a_w']), c1, c_p),
         _pad_mat(_w1x1(params['cv_b_w']), c1, c_p)], axis=1)

    # bottleneck chain: per-layer weights stacked along a leading layer axis
    w1s, s1s, b1s, w9s, s2s, b2s = [], [], [], [], [], []
    for bp in params['bottlenecks']:
        s1, b1 = fold_bn(**bp['cv1_bn'])
        s2, b2 = fold_bn(**bp['cv2_bn'])
        taps = _w3x3_taps(bp['cv2_w'])                                  # (9, c_, c_)
        taps = jnp.pad(taps, ((0, 0), (0, c_p - c_), (0, c_p - c_)))
        w1s.append(_pad_mat(_w1x1(bp['cv1_w']), c_p, c_p))
        s1s.append(_pad_vec(s1, c_p, 1.0))
        b1s.append(_pad_vec(b1, c_p, 0.0))
        w9s.append(taps.reshape(9 * c_p, c_p).astype(jnp.bfloat16))     # K = 9*c_p
        s2s.append(_pad_vec(s2, c_p, 1.0))
        b2s.append(_pad_vec(b2, c_p, 0.0))

    # tail: outer BN split over the (a, yb) halves; cv2 weight split along its K axis
    sb, bb = fold_bn(**params['bn'])
    w2 = _w1x1(params['cv2_w'])                          # (2*c_, c2)
    s3, b3 = fold_bn(**params['cv2_bn'])
    tail = dict(
        wc1=_pad_mat(_w1x1(params['cv1_w']), c_p, c_p),
        psa=_pad_vec(sb[:c_], c_p, 1.0), pba=_pad_vec(bb[:c_], c_p, 0.0),
        psy=_pad_vec(sb[c_:], c_p, 1.0), pby=_pad_vec(bb[c_:], c_p, 0.0),
        wt=_pad_mat(w2[:c_], c_p, c2p), wb=_pad_mat(w2[c_:], c_p, c2p),
        s=_pad_vec(s3, c2p, 1.0), b=_pad_vec(b3, c2p, 0.0))

    return dict(c2=c2, c_p=c_p, c2p=c2p, policy=policy, w_ab=w_ab,
                w1=jnp.stack(w1s), s1=jnp.stack(s1s), b1=jnp.stack(b1s),
                w9=jnp.stack(w9s), s2=jnp.stack(s2s), b2=jnp.stack(b2s),
                tail=tail)


# ---------------------------------------------------------------------------
# Deterministic synthetic parameters (mirrors the module __init__ shapes)
# ---------------------------------------------------------------------------
def init_params(key, c1, c2, n=1, e=0.5):
    c_ = int(c1 * e)
    keys = iter(jax.random.split(key, 16 + 10 * n))

    def conv_w(cout, cin, k):
        return 0.1 * jax.random.normal(next(keys), (cout, cin, k, k), jnp.float32)

    def bn_p(c):
        return dict(
            gamma=1.0 + 0.1 * jax.random.normal(next(keys), (c,), jnp.float32),
            beta=0.1 * jax.random.normal(next(keys), (c,), jnp.float32),
            mean=0.1 * jax.random.normal(next(keys), (c,), jnp.float32),
            var=jnp.abs(jax.random.normal(next(keys), (c,), jnp.float32)) + 0.5)

    return dict(
        c1=c1, c2=c2, c_=c_, n=n,
        cv_a_w=conv_w(c_, c1, 1),      # raw conv (no BN/act), per the spec
        cv_b_w=conv_w(c_, c1, 1),      # raw conv
        cv1_w=conv_w(c_, c_, 1),       # raw conv
        bn=bn_p(2 * c_),
        cv2_w=conv_w(c2, 2 * c_, 1),
        cv2_bn=bn_p(c2),
        bottlenecks=[dict(
            cv1_w=conv_w(c_, c_, 1), cv1_bn=bn_p(c_),
            cv2_w=conv_w(c_, c_, 3), cv2_bn=bn_p(c_))
            for _ in range(n)],
    )


# ---------------------------------------------------------------------------
# Forward passes (NHWC is the native / fast path; NCHW shim for PyTorch parity)
# ---------------------------------------------------------------------------
def bottleneck_csp_forward_nhwc(prep, x_nhwc):
    N, H, W, C1 = x_nhwc.shape
    M = N * H * W
    c_p, c2p, c2 = prep['c_p'], prep['c2p'], prep['c2']
    policy = prep['policy']

    x2d = x_nhwc.reshape(M, C1)

    # a = cv_a(x), y0 = cv_b(x) — one fused pass over x
    a2d, y2d = stem_conv(x2d, prep['w_ab'], c_p, policy)

    # all n bottlenecks in one pallas_call (f32 carry in VMEM, one HBM write)
    y = bottleneck_chain(y2d.reshape(N, H, W, c_p),
                         prep['w1'], prep['s1'], prep['b1'],
                         prep['w9'], prep['s2'], prep['b2'], policy)

    # cv2( LeakyReLU( BN( cat(a, cv1(y)) ) ) ) — fused, concat eliminated
    t = prep['tail']
    out2d = csp_tail(a2d, y.reshape(M, c_p),
                     t['wc1'], t['psa'], t['pba'], t['psy'], t['pby'],
                     t['wt'], t['wb'], t['s'], t['b'], c2p, policy)

    out = out2d.reshape(N, H, W, c2p)
    return out[..., :c2] if c2p != c2 else out


def bottleneck_csp_forward(prep, x_nchw):
    # NCHW<->NHWC shim only for PyTorch-parity testing; production callers should use
    # bottleneck_csp_forward_nhwc directly to avoid the two extra HBM transpose passes.
    x_nhwc = jnp.transpose(x_nchw, (0, 2, 3, 1))
    out = bottleneck_csp_forward_nhwc(prep, x_nhwc)
    return jnp.transpose(out, (0, 3, 1, 2))


# ---------------------------------------------------------------------------
# Pure-JAX f32 reference (mirrors the PyTorch module exactly), for a sanity check
# ---------------------------------------------------------------------------
def _ref_forward(params, x_nchw):
    def conv1x1(x, w):
        return jnp.einsum('nchw,oc->nohw', x, w[:, :, 0, 0])

    def conv3x3(x, w):
        return jax.lax.conv_general_dilated(
            x, w, (1, 1), ((1, 1), (1, 1)),
            dimension_numbers=('NCHW', 'OIHW', 'NCHW'))

    def bn(x, p, eps=1e-5):
        s = p['gamma'] / jnp.sqrt(p['var'] + eps)
        b = p['beta'] - p['mean'] * s
        return x * s[None, :, None, None] + b[None, :, None, None]

    silu = lambda v: v * jax.nn.sigmoid(v)
    a = conv1x1(x_nchw, params['cv_a_w'])
    y = conv1x1(x_nchw, params['cv_b_w'])
    for bp in params['bottlenecks']:
        t = silu(bn(conv1x1(y, bp['cv1_w']), bp['cv1_bn']))
        y = y + silu(bn(conv3x3(t, bp['cv2_w']), bp['cv2_bn']))
    yb = conv1x1(y, params['cv1_w'])
    z = bn(jnp.concatenate([a, yb], axis=1), params['bn'])
    z = jnp.where(z > 0, z, 0.1 * z)
    return silu(bn(conv1x1(z, params['cv2_w']), params['cv2_bn']))


if __name__ == "__main__":
    key = jax.random.PRNGKey(0)
    kp, kx = jax.random.split(key)
    c1, c2, n = 8, 8, 2
    params = init_params(kp, c1, c2, n=n, e=0.5)
    prep = prepare_weights(params)
    x = jax.random.normal(kx, (2, c1, 16, 16), jnp.float32)   # NCHW, like PyTorch

    out = bottleneck_csp_forward(prep, x)
    out = jax.block_until_ready(out)

    assert out.shape == (2, c2, 16, 16), out.shape
    assert bool(jnp.isfinite(out).all())

    ref = _ref_forward(params, x)
    rel = float(jnp.max(jnp.abs(out - ref)) / (jnp.max(jnp.abs(ref)) + 1e-6))
    assert rel < 5e-2, f"max relative error {rel}"
    print("KERNEL_OK")
</pallas_src>

<mosaic_0001>
module attributes {stable_mosaic.version = 11 : i64} {
  func.func @_stem_kernel(%arg0: i32, %arg1: memref<128x8xf32, #tpu.memory_space<vmem>>, %arg2: memref<8x256xbf16, #tpu.memory_space<vmem>>, %arg3: memref<128x128xbf16, #tpu.memory_space<vmem>>, %arg4: memref<128x128xbf16, #tpu.memory_space<vmem>>) attributes {dimension_semantics = [#tpu.dimension_semantics<parallel>], iteration_bounds = array<i64: 4>, scalar_prefetch = 0 : i64, scratch_operands = 0 : i64, tpu.core_type = #tpu.core_type<tc>, window_params = [{transform_indices = @transform_0, window_bounds = array<i64: 128, 8>}, {pipeline_mode = #tpu.pipeline_mode<synchronous>, transform_indices = @transform_1, window_bounds = array<i64: 8, 256>}, {transform_indices = @transform_2, window_bounds = array<i64: 128, 128>}, {transform_indices = @transform_3, window_bounds = array<i64: 128, 128>}]} {
    %c0 = arith.constant 0 : index
    %c0_0 = arith.constant 0 : index
    %0 = vector.load %arg1[%c0, %c0_0] : memref<128x8xf32, #tpu.memory_space<vmem>>, vector<128x8xf32>
    %1 = arith.truncf %0 : vector<128x8xf32> to vector<128x8xbf16>
    %c0_1 = arith.constant 0 : index
    %c0_2 = arith.constant 0 : index
    %2 = vector.load %arg2[%c0_1, %c0_2] : memref<8x256xbf16, #tpu.memory_space<vmem>>, vector<8x256xbf16>
    %cst = arith.constant dense<0.000000e+00> : vector<128x256xf32>
    %3 = tpu.matmul %1, %2, %cst {dimension_numbers = #tpu.dot_dimension_numbers<[1], [0], [0], [1], [0, 0, 1, 1], [], []>} : vector<128x8xbf16>, vector<8x256xbf16>, vector<128x256xf32> -> vector<128x256xf32>
    %4 = vector.extract_strided_slice %3 {offsets = [0, 0], sizes = [128, 128], strides = [1, 1]} : vector<128x256xf32> to vector<128x128xf32>
    %5 = arith.truncf %4 : vector<128x128xf32> to vector<128x128xbf16>
    %c0_3 = arith.constant 0 : index
    %c0_4 = arith.constant 0 : index
    %6 = vector.load %arg3[%c0_3, %c0_4] : memref<128x128xbf16, #tpu.memory_space<vmem>>, vector<128x128xbf16>
    tpu.vector_store %arg3[%c0_3, %c0_4], %5 {strides = array<i32>} : memref<128x128xbf16, #tpu.memory_space<vmem>>, vector<128x128xbf16>,
    %7 = vector.extract_strided_slice %3 {offsets = [0, 128], sizes = [128, 128], strides = [1, 1]} : vector<128x256xf32> to vector<128x128xf32>
    %8 = arith.truncf %7 : vector<128x128xf32> to vector<128x128xbf16>
    %c0_5 = arith.constant 0 : index
    %c0_6 = arith.constant 0 : index
    %9 = vector.load %arg4[%c0_5, %c0_6] : memref<128x128xbf16, #tpu.memory_space<vmem>>, vector<128x128xbf16>
    tpu.vector_store %arg4[%c0_5, %c0_6], %8 {strides = array<i32>} : memref<128x128xbf16, #tpu.memory_space<vmem>>, vector<128x128xbf16>,
    return
  }
  func.func @transform_0(%arg0: i32) -> (i32, i32) {
    %c0_i32 = arith.constant 0 : i32
    %c0_i32_0 = arith.constant 0 : i32
    return %arg0, %c0_i32 : i32, i32
  }
  func.func @transform_1(%arg0: i32) -> (i32, i32) {
    %c0_i32 = arith.constant 0 : i32
    %c0_i32_0 = arith.constant 0 : i32
    %c0_i32_1 = arith.constant 0 : i32
    return %c0_i32, %c0_i32_0 : i32, i32
  }
  func.func @transform_2(%arg0: i32) -> (i32, i32) {
    %c0_i32 = arith.constant 0 : i32
    %c0_i32_0 = arith.constant 0 : i32
    return %arg0, %c0_i32 : i32, i32
  }
  func.func @transform_3(%arg0: i32) -> (i32, i32) {
    %c0_i32 = arith.constant 0 : i32
    %c0_i32_0 = arith.constant 0 : i32
    return %arg0, %c0_i32 : i32, i32
  }
}

</mosaic_0001>

<bundles_post_ra>
// kernel: tpu_custom_call.1
= control target key start
LH: loop header
LB: loop body
LE: loop exit
PB: predicated region body
PF: predicated region fallthrough
CT: control target
= control target key end

     0   :  { %9 = vsyncpa [#allocation3], 0  ;;  %s1201_s0 = inlined_call_operand.vmem [shape: f32[512,8], index: 0, kind: input, shape index: {}]   ;;  %s1202_s1 = inlined_call_operand.vmem [shape: bf16[8,256], index: 1, kind: input, shape index: {}]   ;;  %s1203_s2 = inlined_call_operand.hbm [shape: bf16[512,128], index: 2, kind: output, shape index: {0}]   ;;  %s1204_s3 = inlined_call_operand.hbm [shape: bf16[512,128], index: 3, kind: output, shape index: {1}]  }
   0x1   :  { %11 = vsyncpa [#allocation3 + $0x1], 0 }
   0x2   :  { %12 = vsyncpa [#allocation5], 0 }
   0x3   :  { %14 = vsyncpa [#allocation5 + $0x1], 0  ;;  %s1008_s12 = smov 0   ;;  %s1010_s13 = smov 0  }
   0x4   :  { %s1012_s14 = smov 0   ;;  %s1014_s15 = smov 0  }
   0x5 LB: > { %s1029_s16 = sadd.s32 4294967295, %s981_s15   ;;  %s649_s17 = sadd.s32 4294967294, %s981_s15   ;;  %s981_s15 = sphi %s1014_s15, %s1210_s15   ;;  %s977_s14 = sphi %s1012_s14, %s1209_s14   ;;  %s973_s13 = sphi %s1010_s13, %s1208_s13   ;;  %s969_s12 = sphi %s1008_s12, %s1207_s12  }
   0x6   : > { %s1033_s18 = sadd.s32 1, %s981_s15   ;;  %s74_s19 = sadd.s32 1, %s977_s14 }
   0x7   : > { %s71_s20 = ssub.s32 %s981_s15, %s1033_s18  ;;  %p84_p0 = scmp.ne.s32.totalorder %s977_s14, %s973_s13 }
   0x8   : > { %p72_p1 = scmp.eq.s32.totalorder %s71_s20, 0  ;;  %p85_p2 = scmp.eq.s32.totalorder %s1029_s16, 3 }
   0x9   : > { %p90_p3 = scmp.ne.s32.totalorder %s973_s13, %s969_s12  ;;  %p91_p4 = scmp.eq.s32.totalorder %s649_s17, 3 }
   0xa   : > { %s1044_s21 = scalar_select %p72_p1, %s977_s14, %s74_s19  }
   0xb   : > { %p1046_p5 = por %p85_p2, %p84_p0  ;;  %p1050_p6 = por %p91_p4, %p90_p3 }
   0xc   : > { %p652_p7 = scmp.ge.s32.totalorder %s981_s15, 1  ;;  %p147_p8 = scmp.lt.s32.totalorder %s981_s15, 5 }
   0xe   : > { %p148_p9 = pnand %p652_p7, %p147_p8 }
   0xf   : > { %v209_v0 = vld [vmem:[%s1202_s1] sm:$0xff] (!%p148_p9)  ;;  %vm240_vm0 = vcmask (!%p148_p9), 1043456   ;;  %s655_s26 = sshll.u32 (!%p148_p9), %s1029_s16, 4  ;;  %v983_v3 = vmov (!%p148_p9), 0   ;;  %vm215_vm1 = vcmask (!%p148_p9), 64512   ;;  %s1090_s4 = sand.u32 (!%p148_p9), 1, %s973_s13  }
  0x10   : > { %151 = sbr.rel (%p148_p9) target bundleno = 309 (0x135), region = 28  ;;  %v658_v1 = vcombine.high (!%p148_p9), %v209_v0, %v209_v0  ;;  %v657_v2 = vcombine.low (!%p148_p9), %v209_v0, %v209_v0  ;;  %279 = vmatprep.mubr.bf16.mxu0 (!%p148_p9), %v983_v3  ;;  %319 = vmatprep.mubr.bf16.mxu1 (!%p148_p9), %v983_v3  ;;  %p177_p10 = scmp.lt.s32.totalorder (!%p148_p9), %s655_s26, 63 }
  0x11   : > { %s653_s5 = sshll.u32 (!%p148_p9), %s1090_s4, 6  ;;  %s740_s8 = sshll.u32 (!%p148_p9), %s1029_s16, 10 }
  0x12   : > { %659 = vmatprep.subr.msk.bf16.mxu0 (!%p148_p9), %vm240_vm0, %v658_v1  ;;  %836 = vmatprep.subr.msk.bf16.mxu1 (!%p148_p9), %vm240_vm0, %v658_v1  ;;  %v242_v4 = vsel (!%p148_p9), %vm240_vm0, %v657_v2, 0  ;;  %s1093_s6 = scalar_lea.vmem (!%p148_p9), [#allocation2], %s653_s5  ;;  %s1097_s7 = scalar_lea.vmem (!%p148_p9), [#allocation4], %s653_s5 }
  0x13   : > { %248 = vmatpush1.bf16.msra.mxu0 (!%p148_p9), %v242_v4  ;;  %837 = vmatpush1.bf16.msra.mxu1 (!%p148_p9), %v242_v4  ;;  %s539_s9 = sshll.u32 (!%p148_p9), %s1093_s6, 4  ;;  %s555_s10 = sshll.u32 (!%p148_p9), %s1097_s7, 4  ;;  %s1117_s9 = int_to_ptr.vmem [resolvable:$true] %s539_s9  ;;  %s1125_s10 = int_to_ptr.vmem [resolvable:$true] %s555_s10 }
  0x14   : > { %s1115_s19 = scalar_lea.hbm (!%p148_p9), %s1203_s2, %s740_s8  ;;  %s1123_s24 = scalar_lea.hbm (!%p148_p9), %s1204_s3, %s740_s8 }
  0x15   : > { %s521_s25 = scalar_lea.sflag (!%p148_p9), [#allocation3], %s1090_s4 }
  0x17   : > { %s1212_s26 = smov (!%p177_p10, %s655_s26), 63 }
  0x18   : > { %s656_s27 = sshll.u32 %s1212_s26, 3  ;;  %s887_s26 = scalar_lea.vmem %s1117_s9, 1024 }
  0x19   : > { %s1063_s30 = scalar_lea.vmem %s1201_s0, %s656_s27  ;;  %p888_p11 = scmp.ne.s32.totalorder %s1117_s9, %s887_s26 }
  0x1a   : > { %v185_v5 = vld [vmem:[%s1063_s30] sm:$0xff]  ;;  %v186_v6 = vld [vmem:[%s1063_s30 + $0x8] sm:$0xff]  ;;  %v187_v11 = vld [vmem:[%s1063_s30 + $0x10] sm:$0xff]  ;;  %s984_s27 = smov [#allocation2]  }
  0x1b   : > { %v193_v7 = vld [vmem:[%s1063_s30 + $0x40] sm:$0xff]  ;;  %v201_v8 = vpack.c.bf16 %v186_v6, %v185_v5  ;;  %v194_v9 = vld [vmem:[%s1063_s30 + $0x48] sm:$0xff]  ;;  %v188_v12 = vld [vmem:[%s1063_s30 + $0x18] sm:$0xff]  ;;  %p889_p12 = pnand %p888_p11, %p1046_p5  ;;  %s891_s28 = sshll.u32 %s984_s27, 4  ;;  %s892_s28 = int_to_ptr.vmem [resolvable:$false] %s891_s28 }
  0x1c   : > { %v205_v10 = vpack.c.bf16 %v194_v9, %v193_v7  ;;  %v195_v13 = vld [vmem:[%s1063_s30 + $0x50] sm:$0xff]  ;;  %v196_v14 = vld [vmem:[%s1063_s30 + $0x58] sm:$0xff]  ;;  %v202_v15 = vpack.c.bf16 %v188_v12, %v187_v11  ;;  %v189_v17 = vld [vmem:[%s1063_s30 + $0x20] sm:$0xff]  ;;  %s893_s29 = scalar_lea.vmem %s892_s28, 2048  ;;  %p894_p0 = scmp.lt.s32.totalorder %s1117_s9, %s892_s28 }
  0x1d   : > { %660 = vmatmul.mubr.msk.bf16.vlgmr.msra.gmra.mrb[0].mxu0 %vm215_vm1, %v201_v8  ;;  %v206_v16 = vpack.c.bf16 %v196_v14, %v195_v13  ;;  %v190_v18 = vld [vmem:[%s1063_s30 + $0x28] sm:$0xff]  ;;  %v197_v19 = vld [vmem:[%s1063_s30 + $0x60] sm:$0xff]  ;;  %v191_v23 = vld [vmem:[%s1063_s30 + $0x30] sm:$0xff]  ;;  %p890_p13 = pneg %p889_p12  ;;  %p895_p1 = scmp.lt.s32.totalorder %s893_s29, %s887_s26 }
  0x1e   : > { %664 = vmatmul.mubr.msk.bf16.vlgmr.msra.gmra.mrb[0].mxu1 %vm215_vm1, %v205_v10  ;;  %289 = vmatprep.mubr.bf16.mxu0 %v983_v3  ;;  %v198_v20 = vld [vmem:[%s1063_s30 + $0x68] sm:$0xff]  ;;  %v203_v21 = vpack.c.bf16 %v190_v18, %v189_v17  ;;  %v192_v24 = vld [vmem:[%s1063_s30 + $0x38] sm:$0xff]  ;;  %v199_v25 = vld [vmem:[%s1063_s30 + $0x70] sm:$0xff] }
  0x1f   : > { %329 = vmatprep.mubr.bf16.mxu1 %v983_v3  ;;  %v207_v22 = vpack.c.bf16 %v198_v20, %v197_v19  ;;  %v200_v26 = vld [vmem:[%s1063_s30 + $0x78] sm:$0xff]  ;;  %v204_v27 = vpack.c.bf16 %v192_v24, %v191_v23  ;;  %p896_p2 = por %p895_p1, %p894_p0 }
  0x20   : > { %v208_v28 = vpack.c.bf16 %v200_v26, %v199_v25 }
  0x21   : > { %p897_p3 = pnand %p896_p2, %p890_p13 }
  0x25   : > { %661 = vmatmul.mubr.msk.bf16.gmra.mrb[4].mxu0 %vm215_vm1, %v202_v15 }
  0x26   : > { %665 = vmatmul.mubr.msk.bf16.gmra.mrb[4].mxu1 %vm215_vm1, %v206_v16  ;;  %299 = vmatprep.mubr.bf16.mxu0 %v983_v3 }
  0x27   : > { %339 = vmatprep.mubr.bf16.mxu1 %v983_v3 }
  0x2d   : > { %662 = vmatmul.mubr.msk.bf16.gmra.mrb[8].mxu0 %vm215_vm1, %v203_v21 }
  0x2e   : > { %666 = vmatmul.mubr.msk.bf16.gmra.mrb[8].mxu1 %vm215_vm1, %v207_v22  ;;  %309 = vmatprep.mubr.bf16.mxu0 %v983_v3 }
  0x2f   : > { %349 = vmatprep.mubr.bf16.mxu1 %v983_v3 }
  0x35   : > { %663 = vmatmul.mubr.msk.bf16.gmra.mrb[12].mxu0 %vm215_vm1, %v204_v27 }
  0x36   : > { %667 = vmatmul.mubr.msk.bf16.gmra.mrb[12].mxu1 %vm215_vm1, %v208_v28 }
  0xf0   : > { %v281_v29 = vpop.f32.mrb[0].mxu0 }
  0xf1   : > { %v321_v30 = vpop.f32.mrb[0].mxu1  ;;  %v283_v31 = vpop.f32.mrb[1].mxu0 }
  0xf2   : > { %v323_v32 = vpop.f32.mrb[1].mxu1  ;;  %v285_v33 = vpop.f32.mrb[2].mxu0 }
  0xf3   : > { %v745_v34 = vpack.c.bf16 %v285_v33, %v281_v29  ;;  %v325_v35 = vpop.f32.mrb[2].mxu1  ;;  %v287_v36 = vpop.f32.mrb[3].mxu0 }
  0xf4   : > { %v765_v37 = vpack.c.bf16 %v325_v35, %v321_v30  ;;  %v785_v38 = vpack.c.bf16 %v287_v36, %v283_v31  ;;  %v327_v39 = vpop.f32.mrb[3].mxu1 }
  0xf5   : > { %746 = vst [vmem:[%s1093_s6] sm:$0xff] %v745_v34   ;;  %v805_v40 = vpack.c.bf16 %v327_v39, %v323_v32 }
  0xf6   : > { %825 = vst [vmem:[%s1093_s6 + $0x20] sm:$0xff] %v765_v37   ;;  %786 = vst [vmem:[%s1097_s7] sm:$0xff] %v785_v38  }
  0xf7   : > { %832 = vst [vmem:[%s1097_s7 + $0x20] sm:$0xff] %v805_v40  }
  0xf8   : > { %v291_v41 = vpop.f32.mrb[4].mxu0 }
  0xf9   : > { %v331_v42 = vpop.f32.mrb[4].mxu1  ;;  %v293_v43 = vpop.f32.mrb[5].mxu0 }
  0xfa   : > { %v333_v44 = vpop.f32.mrb[5].mxu1  ;;  %v295_v45 = vpop.f32.mrb[6].mxu0 }
  0xfb   : > { %v750_v46 = vpack.c.bf16 %v295_v45, %v291_v41  ;;  %v335_v47 = vpop.f32.mrb[6].mxu1  ;;  %v297_v48 = vpop.f32.mrb[7].mxu0 }
  0xfc   : > { %v770_v49 = vpack.c.bf16 %v335_v47, %v331_v42  ;;  %v790_v50 = vpack.c.bf16 %v297_v48, %v293_v43  ;;  %v337_v51 = vpop.f32.mrb[7].mxu1 }
  0xfd   : > { %822 = vst [vmem:[%s1093_s6 + $0x8] sm:$0xff] %v750_v46   ;;  %v810_v52 = vpack.c.bf16 %v337_v51, %v333_v44 }
  0xfe   : > { %826 = vst [vmem:[%s1093_s6 + $0x28] sm:$0xff] %v770_v49   ;;  %829 = vst [vmem:[%s1097_s7 + $0x8] sm:$0xff] %v790_v50  }
  0xff   : > { %833 = vst [vmem:[%s1097_s7 + $0x28] sm:$0xff] %v810_v52  }
 0x100   : > { %v301_v53 = vpop.f32.mrb[8].mxu0 }
 0x101   : > { %v341_v54 = vpop.f32.mrb[8].mxu1  ;;  %v303_v55 = vpop.f32.mrb[9].mxu0 }
 0x102   : > { %v343_v56 = vpop.f32.mrb[9].mxu1  ;;  %v305_v57 = vpop.f32.mrb[10].mxu0 }
 0x103   : > { %v755_v58 = vpack.c.bf16 %v305_v57, %v301_v53  ;;  %v345_v59 = vpop.f32.mrb[10].mxu1  ;;  %v307_v60 = vpop.f32.mrb[11].mxu0 }
 0x104   : > { %v775_v61 = vpack.c.bf16 %v345_v59, %v341_v54  ;;  %v795_v62 = vpack.c.bf16 %v307_v60, %v303_v55  ;;  %v347_v63 = vpop.f32.mrb[11].mxu1 }
 0x105   : > { %823 = vst [vmem:[%s1093_s6 + $0x10] sm:$0xff] %v755_v58   ;;  %v815_v0 = vpack.c.bf16 %v347_v63, %v343_v56 }
 0x106   : > { %827 = vst [vmem:[%s1093_s6 + $0x30] sm:$0xff] %v775_v61   ;;  %830 = vst [vmem:[%s1097_s7 + $0x10] sm:$0xff] %v795_v62  }
 0x107   : > { %834 = vst [vmem:[%s1097_s7 + $0x30] sm:$0xff] %v815_v0  }
 0x108   : > { %v311_v1 = vpop.f32.mrb[12].mxu0 }
 0x109   : > { %v351_v2 = vpop.f32.mrb[12].mxu1  ;;  %v313_v3 = vpop.f32.mrb[13].mxu0 }
 0x10a   : > { %v353_v4 = vpop.f32.mrb[13].mxu1  ;;  %v315_v5 = vpop.f32.mrb[14].mxu0 }
 0x10b   : > { %v760_v6 = vpack.c.bf16 %v315_v5, %v311_v1  ;;  %v355_v7 = vpop.f32.mrb[14].mxu1  ;;  %v317_v8 = vpop.f32.mrb[15].mxu0 }
 0x10c   : > { %v780_v9 = vpack.c.bf16 %v355_v7, %v351_v2  ;;  %v800_v10 = vpack.c.bf16 %v317_v8, %v313_v3  ;;  %v357_v11 = vpop.f32.mrb[15].mxu1 }
 0x10d   : > { %824 = vst [vmem:[%s1093_s6 + $0x18] sm:$0xff] %v760_v6   ;;  %v820_v12 = vpack.c.bf16 %v357_v11, %v353_v4 }
 0x10e   : > { %828 = vst [vmem:[%s1093_s6 + $0x38] sm:$0xff] %v780_v9   ;;  %831 = vst [vmem:[%s1097_s7 + $0x18] sm:$0xff] %v800_v10  }
 0x10f   : > { %835 = vst [vmem:[%s1097_s7 + $0x38] sm:$0xff] %v820_v12  }
 0x110   : > { %900 = shalt.err (!%p897_p3)
}
 0x111   : > { %s901_s30 = scalar_lea.hbm %s1115_s19, 1024  ;;  %s905_s7 = scalar_lea.hbm %s1203_s2, 4096 }
 0x112   : > { %p902_p4 = scmp.ne.s32.totalorder %s1115_s19, %s901_s30  ;;  %p906_p9 = scmp.lt.u32.totalorder %s1115_s19, %s1203_s2 }
 0x113   : > { %p907_p10 = scmp.lt.u32.totalorder %s905_s7, %s901_s30  ;;  %p909_p12 = scmp.lt.u32.totalorder %s901_s30, %s1115_s19 }
 0x114   : > { %p903_p7 = pnand %p902_p4, %p1046_p5 }
 0x115   : > { %p908_p11 = por %p907_p10, %p906_p9 }
 0x116   : > { %p904_p8 = pneg %p903_p7 }
 0x117   : > { %p910_p13 = por %p909_p12, %p908_p11 }
 0x119   : > { %p911_p0 = pnand %p910_p13, %p904_p8 }
 0x11b   : > { %914 = shalt.err (!%p911_p0)
}
 0x11c   : > { %s985_s17 = smov 64   ;;  %s986_s16 = smov 4  }
 0x11d   : > { %838 = dma.vmem_to_hbm [thread:$0]  (%p1046_p5), %s1117_s9, 1024, %s1115_s19, %s521_s25, %s985_s17, %s985_s17, %s986_s16  }
 0x11e   : > { %s526_s20 = scalar_lea.sflag [#allocation5], %s1090_s4  ;;  %s915_s26 = scalar_lea.vmem %s1125_s10, 1024 }
 0x11f   : > { %p916_p1 = scmp.ne.s32.totalorder %s1125_s10, %s915_s26  ;;  %s987_s27 = smov [#allocation4]  }
 0x120   : > { %s919_s28 = sshll.u32 %s987_s27, 4  ;;  %s920_s28 = int_to_ptr.vmem [resolvable:$false] %s919_s28 }
 0x121   : > { %p917_p2 = pnand %p916_p1, %p1046_p5  ;;  %s921_s29 = scalar_lea.vmem %s920_s28, 2048 }
 0x122   : > { %p922_p4 = scmp.lt.s32.totalorder %s1125_s10, %s920_s28  ;;  %p923_p7 = scmp.lt.s32.totalorder %s921_s29, %s915_s26 }
 0x123   : > { %p918_p3 = pneg %p917_p2 }
 0x124   : > { %p924_p8 = por %p923_p7, %p922_p4 }
 0x126   : > { %p925_p9 = pnand %p924_p8, %p918_p3 }
 0x128   : > { %928 = shalt.err (!%p925_p9)
}
 0x129   : > { %s929_s9 = scalar_lea.hbm %s1123_s24, 1024  ;;  %s933_s30 = scalar_lea.hbm %s1204_s3, 4096 }
 0x12a   : > { %p930_p10 = scmp.ne.s32.totalorder %s1123_s24, %s929_s9  ;;  %p934_p13 = scmp.lt.u32.totalorder %s1123_s24, %s1204_s3 }
 0x12b   : > { %p935_p0 = scmp.lt.u32.totalorder %s933_s30, %s929_s9  ;;  %p937_p2 = scmp.lt.u32.totalorder %s929_s9, %s1123_s24 }
 0x12c   : > { %p931_p11 = pnand %p930_p10, %p1046_p5 }
 0x12d   : > { %p936_p1 = por %p935_p0, %p934_p13 }
 0x12e   : > { %p932_p12 = pneg %p931_p11 }
 0x12f   : > { %p938_p3 = por %p937_p2, %p936_p1 }
 0x131   : > { %p939_p4 = pnand %p938_p3, %p932_p12 }
 0x133   : > { %942 = shalt.err (!%p939_p4)
}
 0x134   : > { %839 = dma.vmem_to_hbm [thread:$0]  (%p1046_p5), %s1125_s10, 1024, %s1123_s24, %s526_s20, %s985_s17, %s985_s17, %s986_s16  }
 0x135 PF: > { %p849_p7 = scmp.ge.s32.totalorder %s981_s15, 2  ;;  %s570_s7 = sand.u32 1, %s969_s12  }
 0x136   : > { %s571_s8 = scalar_lea.sflag [#allocation3], %s570_s7 }
 0x137   : > { %p843_p8 = pnand %p849_p7, %p1050_p6 }
 0x139   : > { %960 = dma.done.wait (!%p843_p8), %s571_s8, 1024  }
 0x13a   : > { %962 = vsyncadd (!%p843_p8), %s571_s8, 4294966272  ;;  %s580_s22 = scalar_lea.sflag [#allocation5], %s570_s7 }
 0x13b   : > { %964 = dma.done.wait (!%p843_p8), %s580_s22, 1024  }
 0x13c   : > { %966 = vsyncadd (!%p843_p8), %s580_s22, 4294966272  ;;  %p17_p5 = scmp.ge.s32.totalorder %s1033_s18, 6   ;;  %s1207_s12 = smov %s973_s13 }
 0x13d   : > { %s1208_s13 = smov %s977_s14  ;;  %s1209_s14 = smov %s1044_s21 }
 0x13e   : > { %s1210_s15 = smov %s1033_s18  ;;  %19 = sbr.rel (!%p17_p5) target bundleno = 5 (0x5), region = 80 }
 0x145   :  { %585 = vsyncpa [#allocation3], 1 }
 0x146   :  { %587 = vsyncpa [#allocation3 + $0x1], 1 }
 0x147   :  { %588 = vsyncpa [#allocation5], 1 }
 0x148   :  { %590 = vsyncpa [#allocation5 + $0x1], 1 }

</bundles_post_ra>
